<compile_context>
chip_gen: v7x
topology: tpu7x:2x2x1
jax: 0.10.0
libtpu: 0.0.40
codegen_flags: <defaults>
</compile_context>

<pallas_src>
import jax
import jax.numpy as jnp
from jax.experimental import pallas as pl
from jax.experimental.pallas import tpu as pltpu

LANE = 128     # TPU lane width: one 128-lane slab holds all weights (hidden, classes <= 128)
ALIGN = 16     # row alignment inside the slab (covers f32 (8) and bf16 (16) sublane packing)


def _leaky_relu(v, slope=0.01):
    return jnp.where(v > 0, v, slope * v)


def _round_up(n, m):
    return ((n + m - 1) // m) * m


def _slab_layout(in_dim, hidden):
    """Row offsets of every segment in the packed weight slab (all ALIGN-row aligned)."""
    r_w1 = 0
    r_w23 = _round_up(r_w1 + in_dim, ALIGN)
    r_w4 = _round_up(r_w23 + hidden, ALIGN)
    r_w5 = _round_up(r_w4 + hidden, ALIGN)
    r_b1 = _round_up(r_w5 + hidden, ALIGN)
    r_b23 = r_b1 + ALIGN
    r_b4 = r_b23 + ALIGN
    r_b5 = r_b4 + ALIGN
    rows = _round_up(r_b5 + ALIGN, 32)
    return dict(w1=r_w1, w23=r_w23, w4=r_w4, w5=r_w5,
                b1=r_b1, b23=r_b23, b4=r_b4, b5=r_b5, rows=rows)


def pack_params(params, in_dim, hidden, num_classes, compute_dtype):
    """Fuse w2/w3 (exact algebra, eval-mode only) and pack everything into one
    [rows, 128] slab in `compute_dtype`.  Fusion & packing done in f32, cast last."""
    assert hidden <= LANE, f"hidden={hidden} must be <= {LANE} for the single-slab layout"
    assert num_classes <= LANE, f"num_classes={num_classes} must be <= {LANE}"
    (w1, b1), (w2, b2), (w3, b3), (w4, b4), (w5, b5) = params
    w23 = w2 @ w3                       # no nonlinearity between emb_layers[3] / outlayers[0]
    b23 = b2 @ w3 + b3

    lay = _slab_layout(in_dim, hidden)
    slab = jnp.zeros((lay["rows"], LANE), jnp.float32)
    slab = slab.at[lay["w1"]:lay["w1"] + in_dim, :hidden].set(w1)
    slab = slab.at[lay["w23"]:lay["w23"] + hidden, :hidden].set(w23)
    slab = slab.at[lay["w4"]:lay["w4"] + hidden, :hidden].set(w4)
    slab = slab.at[lay["w5"]:lay["w5"] + hidden, :num_classes].set(w5)
    slab = slab.at[lay["b1"], :hidden].set(b1)
    slab = slab.at[lay["b23"], :hidden].set(b23)
    slab = slab.at[lay["b4"], :hidden].set(b4)
    slab = slab.at[lay["b5"], :num_classes].set(b5)
    return slab.astype(compute_dtype), lay


def _make_kernel(lay, in_dim, hidden, num_classes, compute_dtype):
    r_w1, r_w23, r_w4, r_w5 = lay["w1"], lay["w23"], lay["w4"], lay["w5"]
    r_b1, r_b23, r_b4, r_b5 = lay["b1"], lay["b23"], lay["b4"], lay["b5"]

    def net_kernel(x_ref, slab_ref, o_ref):
        # x tile: [tile_b, in_dim] in compute_dtype.  Weight slab stays VMEM-resident
        # (constant index_map); all reads below are static Ref-view slices.
        x = x_ref[...]

        # emb_layers: Linear -> Dropout(id) -> LeakyReLU            (f32 accumulation)
        h = jnp.dot(x, slab_ref[r_w1:r_w1 + in_dim, 0:hidden],
                    preferred_element_type=jnp.float32)
        h = _leaky_relu(h + slab_ref[r_b1:r_b1 + 1, 0:hidden].astype(jnp.float32))

        # fused (emb_layers final Linear) o (outlayers first Linear) -> LeakyReLU
        h = jnp.dot(h.astype(compute_dtype), slab_ref[r_w23:r_w23 + hidden, 0:hidden],
                    preferred_element_type=jnp.float32)
        h = _leaky_relu(h + slab_ref[r_b23:r_b23 + 1, 0:hidden].astype(jnp.float32))

        # outlayers: Linear -> Dropout(id) -> LeakyReLU
        h = jnp.dot(h.astype(compute_dtype), slab_ref[r_w4:r_w4 + hidden, 0:hidden],
                    preferred_element_type=jnp.float32)
        h = _leaky_relu(h + slab_ref[r_b4:r_b4 + 1, 0:hidden].astype(jnp.float32))

        # final Linear (narrow, num_classes lanes) -> Dropout(id)
        out = jnp.dot(h.astype(compute_dtype), slab_ref[r_w5:r_w5 + hidden, 0:num_classes],
                      preferred_element_type=jnp.float32)
        out = out + slab_ref[r_b5:r_b5 + 1, 0:num_classes].astype(jnp.float32)
        o_ref[...] = out.astype(o_ref.dtype)

    return net_kernel


def net_forward(x, params, *, tile_b=4096, compute_dtype=jnp.bfloat16):
    """x: [batch, input_size] float32; params: list of (W[in,out], b[out]) pairs."""
    batch, in_dim = x.shape
    hidden = params[0][0].shape[1]
    num_classes = params[-1][0].shape[1]
    itemsize = jnp.dtype(compute_dtype).itemsize
    sub = {4: 8, 2: 16, 1: 32}[itemsize]          # sublane multiple for the batch tile

    # --- batch tiling ---------------------------------------------------------
    tile_b = max(sub, min(int(tile_b), batch))
    # keep double-buffered x/out tiles well under the default scoped-VMEM budget
    bytes_per_row = in_dim * itemsize + num_classes * 4
    max_rows = max(sub, ((12 << 20) // (2 * bytes_per_row)) // sub * sub)
    tile_b = min(tile_b, max_rows)
    # prefer >= 2 grid steps so v7x's two TensorCores both get work
    if batch >= 2 * sub:
        tile_b = min(tile_b, pl.cdiv(pl.cdiv(batch, 2), sub) * sub)
    tile_b = max(sub, (tile_b // sub) * sub)
    grid_b = pl.cdiv(batch, tile_b)
    pad_batch = grid_b * tile_b
    if pad_batch != batch:
        x = jnp.pad(x, ((0, pad_batch - batch), (0, 0)))

    x = x.astype(compute_dtype)
    slab, lay = pack_params(params, in_dim, hidden, num_classes, compute_dtype)
    kernel = _make_kernel(lay, in_dim, hidden, num_classes, compute_dtype)

    out = pl.pallas_call(
        kernel,
        out_shape=jax.ShapeDtypeStruct((pad_batch, num_classes), jnp.float32),
        grid_spec=pltpu.PrefetchScalarGridSpec(
            num_scalar_prefetch=0,
            grid=(grid_b,),
            in_specs=[
                pl.BlockSpec((tile_b, in_dim), lambda i: (i, 0)),   # pipelined x tiles
                pl.BlockSpec(slab.shape, lambda i: (0, 0)),         # VMEM-resident weights
            ],
            out_specs=pl.BlockSpec((tile_b, num_classes), lambda i: (i, 0)),  # narrow output
        ),
        compiler_params=pltpu.CompilerParams(
            dimension_semantics=("parallel",),      # shard batch across TCs on v7x
        ),
    )(x, slab)

    return out[:batch]


def init_params(key, input_size, num_classes, hidden=8):
    """PyTorch-style uniform(-1/sqrt(fan_in), 1/sqrt(fan_in)); weights stored [in, out]."""
    dims = [
        (input_size, hidden),   # emb_layers[0]
        (hidden, hidden),       # emb_layers[3]
        (hidden, hidden),       # outlayers[0]
        (hidden, hidden),       # outlayers[3]
        (hidden, num_classes),  # outlayers[6]
    ]
    params = []
    for (fan_in, fan_out) in dims:
        key, kw, kb = jax.random.split(key, 3)
        bound = 1.0 / jnp.sqrt(fan_in)
        w = jax.random.uniform(kw, (fan_in, fan_out), jnp.float32, -bound, bound)
        b = jax.random.uniform(kb, (fan_out,), jnp.float32, -bound, bound)
        params.append((w, b))
    return params


def reference_forward(x, params):
    """Pure-JAX f32 reference of the (unfused) forward pass, eval mode."""
    (w1, b1), (w2, b2), (w3, b3), (w4, b4), (w5, b5) = params
    h = _leaky_relu(x @ w1 + b1)
    emb = h @ w2 + b2
    h = _leaky_relu(emb @ w3 + b3)
    h = _leaky_relu(h @ w4 + b4)
    return h @ w5 + b5


if __name__ == "__main__":
    batch = 64
    input_size = 32
    hidden = 8
    num_classes = 4

    key = jax.random.PRNGKey(0)
    key, kx = jax.random.split(key)
    x = jax.random.normal(kx, (batch, input_size), jnp.float32)
    params = init_params(key, input_size, num_classes, hidden)

    ref = reference_forward(x, params)

    # 1) f32 compute path, small tile -> exercises the multi-step pipelined batch grid;
    #    tight check validates slab packing / offsets / fusion (w2@w3 reassociates f32
    #    rounding slightly -> 1e-4 tol).
    out_f32 = jax.block_until_ready(
        net_forward(x, params, tile_b=8, compute_dtype=jnp.float32))
    assert out_f32.shape == (batch, num_classes), out_f32.shape
    assert jnp.allclose(out_f32, ref, atol=1e-4, rtol=1e-4), "f32 kernel mismatch vs reference"

    # 2) default bf16 fast path (grid_b >= 2 so both v7x TCs get work); quantization-
    #    tolerant relative-L2 check against the f32 reference.
    out_bf16 = jax.block_until_ready(net_forward(x, params))
    assert out_bf16.shape == (batch, num_classes), out_bf16.shape
    rel_l2 = jnp.linalg.norm(out_bf16 - ref) / jnp.linalg.norm(ref)
    assert float(rel_l2) < 5e-2, f"bf16 kernel rel-L2 error too large: {float(rel_l2)}"

    print("KERNEL_OK")
</pallas_src>

<mosaic_0001>
module attributes {stable_mosaic.version = 11 : i64} {
  func.func @net_kernel(%arg0: i32, %arg1: memref<8x32xf32, #tpu.memory_space<vmem>>, %arg2: memref<160x128xf32, #tpu.memory_space<vmem>>, %arg3: memref<8x4xf32, #tpu.memory_space<vmem>>) attributes {dimension_semantics = [#tpu.dimension_semantics<parallel>], iteration_bounds = array<i64: 8>, scalar_prefetch = 0 : i64, scratch_operands = 0 : i64, tpu.core_type = #tpu.core_type<tc>, window_params = [{transform_indices = @transform_0, window_bounds = array<i64: 8, 32>}, {pipeline_mode = #tpu.pipeline_mode<synchronous>, transform_indices = @transform_1, window_bounds = array<i64: 160, 128>}, {transform_indices = @transform_2, window_bounds = array<i64: 8, 4>}]} {
    %c0 = arith.constant 0 : index
    %c0_0 = arith.constant 0 : index
    %0 = vector.load %arg1[%c0, %c0_0] : memref<8x32xf32, #tpu.memory_space<vmem>>, vector<8x32xf32>
    %c0_1 = arith.constant 0 : index
    %c0_2 = arith.constant 0 : index
    %1 = vector.load %arg2[%c0_1, %c0_2] : memref<160x128xf32, #tpu.memory_space<vmem>>, vector<32x8xf32>
    %cst = arith.constant dense<0.000000e+00> : vector<8x8xf32>
    %2 = tpu.matmul %0, %1, %cst {dimension_numbers = #tpu.dot_dimension_numbers<[1], [0], [0], [1], [0, 0, 1, 1], [], []>} : vector<8x32xf32>, vector<32x8xf32>, vector<8x8xf32> -> vector<8x8xf32>
    %c80 = arith.constant 80 : index
    %c0_3 = arith.constant 0 : index
    %3 = vector.load %arg2[%c80, %c0_3] : memref<160x128xf32, #tpu.memory_space<vmem>>, vector<1x8xf32>
    %4 = vector.broadcast %3 : vector<1x8xf32> to vector<8x8xf32>
    %5 = arith.addf %2, %4 : vector<8x8xf32>
    %cst_4 = arith.constant 0.000000e+00 : f32
    %6 = vector.broadcast %cst_4 : f32 to vector<8x8xf32>
    %7 = arith.cmpf ogt, %5, %6 : vector<8x8xf32>
    %cst_5 = arith.constant 0.00999999977 : f32
    %8 = vector.broadcast %cst_5 : f32 to vector<8x8xf32>
    %9 = arith.mulf %8, %5 : vector<8x8xf32>
    %10 = arith.select %7, %5, %9 : vector<8x8xi1>, vector<8x8xf32>
    %c32 = arith.constant 32 : index
    %c0_6 = arith.constant 0 : index
    %11 = vector.load %arg2[%c32, %c0_6] : memref<160x128xf32, #tpu.memory_space<vmem>>, vector<8x8xf32>
    %cst_7 = arith.constant dense<0.000000e+00> : vector<8x8xf32>
    %12 = tpu.matmul %10, %11, %cst_7 {dimension_numbers = #tpu.dot_dimension_numbers<[1], [0], [0], [1], [0, 0, 1, 1], [], []>} : vector<8x8xf32>, vector<8x8xf32>, vector<8x8xf32> -> vector<8x8xf32>
    %c96 = arith.constant 96 : index
    %c0_8 = arith.constant 0 : index
    %13 = vector.load %arg2[%c96, %c0_8] : memref<160x128xf32, #tpu.memory_space<vmem>>, vector<1x8xf32>
    %14 = vector.broadcast %13 : vector<1x8xf32> to vector<8x8xf32>
    %15 = arith.addf %12, %14 : vector<8x8xf32>
    %cst_9 = arith.constant 0.000000e+00 : f32
    %16 = vector.broadcast %cst_9 : f32 to vector<8x8xf32>
    %17 = arith.cmpf ogt, %15, %16 : vector<8x8xf32>
    %cst_10 = arith.constant 0.00999999977 : f32
    %18 = vector.broadcast %cst_10 : f32 to vector<8x8xf32>
    %19 = arith.mulf %18, %15 : vector<8x8xf32>
    %20 = arith.select %17, %15, %19 : vector<8x8xi1>, vector<8x8xf32>
    %c48 = arith.constant 48 : index
    %c0_11 = arith.constant 0 : index
    %21 = vector.load %arg2[%c48, %c0_11] : memref<160x128xf32, #tpu.memory_space<vmem>>, vector<8x8xf32>
    %cst_12 = arith.constant dense<0.000000e+00> : vector<8x8xf32>
    %22 = tpu.matmul %20, %21, %cst_12 {dimension_numbers = #tpu.dot_dimension_numbers<[1], [0], [0], [1], [0, 0, 1, 1], [], []>} : vector<8x8xf32>, vector<8x8xf32>, vector<8x8xf32> -> vector<8x8xf32>
    %c112 = arith.constant 112 : index
    %c0_13 = arith.constant 0 : index
    %23 = vector.load %arg2[%c112, %c0_13] : memref<160x128xf32, #tpu.memory_space<vmem>>, vector<1x8xf32>
    %24 = vector.broadcast %23 : vector<1x8xf32> to vector<8x8xf32>
    %25 = arith.addf %22, %24 : vector<8x8xf32>
    %cst_14 = arith.constant 0.000000e+00 : f32
    %26 = vector.broadcast %cst_14 : f32 to vector<8x8xf32>
    %27 = arith.cmpf ogt, %25, %26 : vector<8x8xf32>
    %cst_15 = arith.constant 0.00999999977 : f32
    %28 = vector.broadcast %cst_15 : f32 to vector<8x8xf32>
    %29 = arith.mulf %28, %25 : vector<8x8xf32>
    %30 = arith.select %27, %25, %29 : vector<8x8xi1>, vector<8x8xf32>
    %c64 = arith.constant 64 : index
    %c0_16 = arith.constant 0 : index
    %31 = vector.load %arg2[%c64, %c0_16] : memref<160x128xf32, #tpu.memory_space<vmem>>, vector<8x4xf32>
    %cst_17 = arith.constant dense<0.000000e+00> : vector<8x4xf32>
    %32 = tpu.matmul %30, %31, %cst_17 {dimension_numbers = #tpu.dot_dimension_numbers<[1], [0], [0], [1], [0, 0, 1, 1], [], []>} : vector<8x8xf32>, vector<8x4xf32>, vector<8x4xf32> -> vector<8x4xf32>
    %c128 = arith.constant 128 : index
    %c0_18 = arith.constant 0 : index
    %33 = vector.load %arg2[%c128, %c0_18] : memref<160x128xf32, #tpu.memory_space<vmem>>, vector<1x4xf32>
    %34 = vector.broadcast %33 : vector<1x4xf32> to vector<8x4xf32>
    %35 = arith.addf %32, %34 : vector<8x4xf32>
    %c0_19 = arith.constant 0 : index
    %c0_20 = arith.constant 0 : index
    %36 = vector.load %arg3[%c0_19, %c0_20] : memref<8x4xf32, #tpu.memory_space<vmem>>, vector<8x4xf32>
    tpu.vector_store %arg3[%c0_19, %c0_20], %35 {strides = array<i32>} : memref<8x4xf32, #tpu.memory_space<vmem>>, vector<8x4xf32>,
    return
  }
  func.func @transform_0(%arg0: i32) -> (i32, i32) {
    %c0_i32 = arith.constant 0 : i32
    %c0_i32_0 = arith.constant 0 : i32
    return %arg0, %c0_i32 : i32, i32
  }
  func.func @transform_1(%arg0: i32) -> (i32, i32) {
    %c0_i32 = arith.constant 0 : i32
    %c0_i32_0 = arith.constant 0 : i32
    %c0_i32_1 = arith.constant 0 : i32
    return %c0_i32, %c0_i32_0 : i32, i32
  }
  func.func @transform_2(%arg0: i32) -> (i32, i32) {
    %c0_i32 = arith.constant 0 : i32
    %c0_i32_0 = arith.constant 0 : i32
    return %arg0, %c0_i32 : i32, i32
  }
}

</mosaic_0001>

<bundles_post_ra>
// kernel: tpu_custom_call.1
= control target key start
LH: loop header
LB: loop body
LE: loop exit
PB: predicated region body
PF: predicated region fallthrough
CT: control target
= control target key end

     0   :  { %7 = vsyncpa [#allocation3], 0  ;;  %s699_s9 = smov 0   ;;  %s769_s0 = inlined_call_operand.vmem [shape: f32[64,32], index: 0, kind: input, shape index: {}]   ;;  %s770_s1 = inlined_call_operand.hbm [shape: f32[160,128], index: 1, kind: input, shape index: {}]   ;;  %s771_s2 = inlined_call_operand.vmem [shape: f32[64,4], index: 2, kind: output, shape index: {}]  }
   0x1 LB: > { %s705_s10 = sadd.s32 4294967295, %s676_s9   ;;  %p554_p0 = scmp.ge.s32.totalorder %s676_s9, 1  ;;  %s676_s9 = sphi %s699_s9, %s13_s9  }
   0x2   : > { %p91_p1 = scmp.lt.s32.totalorder %s676_s9, 9  ;;  %s678_s11 = smov [#allocation2]  }
   0x3   : > { %s103_s12 = sshll.u32 %s678_s11, 4  ;;  %p772_p3 = scmp.eq.s32.totalorder %s705_s10, 0  ;;  %s104_s12 = int_to_ptr.vmem [resolvable:$true] %s103_s12 }
   0x4   : > { %p709_p2 = pnand %p554_p0, %p91_p1  ;;  %s638_s17 = scalar_lea.hbm %s770_s1, 2560 }
   0x5   : > { %p639_p6 = scmp.ne.s32.totalorder %s770_s1, %s638_s17  ;;  %p645_p10 = scmp.lt.u32.totalorder %s638_s17, %s770_s1 }
   0x6   : > { %s774_s13 = scalar_select %p709_p2, 1, 0 }
   0x7   : > { %p618_p4 = pneg %p709_p2 }
   0x9   : > { %p718_p5 = pnand %p772_p3, %p618_p4 }
   0xb   : > { %p640_p7 = pneg %p718_p5 }
   0xd   : > { %p641_p8 = pnand %p640_p7, %p639_p6 }
   0xf   : > { %p642_p9 = pneg %p641_p8 }
  0x11   : > { %p647_p11 = pnand %p645_p10, %p642_p9 }
  0x13   : > { %650 = shalt.err (!%p647_p11)
}
  0x14   : > { %s651_s22 = scalar_lea.vmem %s104_s12, 2560  ;;  %p659_p1 = scmp.lt.s32.totalorder %s104_s12, %s104_s12 }
  0x15   : > { %p652_p12 = scmp.ne.s32.totalorder %s104_s12, %s651_s22  ;;  %p660_p4 = scmp.lt.s32.totalorder %s651_s22, %s651_s22 }
  0x17   : > { %p654_p13 = pnand %p652_p12, %p640_p7  ;;  %p661_p3 = por %p660_p4, %p659_p1 }
  0x19   : > { %p655_p0 = pneg %p654_p13 }
  0x1b   : > { %p662_p2 = pnand %p661_p3, %p655_p0 }
  0x1d   : > { %665 = shalt.err (!%p662_p2)
}
  0x1e   : > { %s679_s23 = smov 128   ;;  %s680_s24 = smov 8  }
  0x1f   : > { %621 = dma.hbm_to_vmem [thread:$0]  (!%p718_p5), %s770_s1, 2560, %s104_s12, [#allocation3], %s679_s23, %s679_s23, %s680_s24  }
  0x20   : > { %p776_p6 = scmp.ne.s32.totalorder %s774_s13, 0 }
  0x21   : > { %p777_p8 = scmp.eq.s32.totalorder (!%p776_p6), %s705_s10, 0 }
  0x22   : > { %126 = sbr.rel (%p776_p6) target bundleno = 918 (0x396), region = 28 }
  0x29   : > { %671 = dma.done.wait (%p777_p8), [#allocation3], 2560   ;;  %p778_p7 = pmov %p777_p8 }
  0x2a   : > { %p146_p2 = scmp.lt.s32.totalorder %s705_s10, 7  ;;  %v681_v0 = vmov 0.0|0.0   ;;  %vm682_vm0 = vmmov 0   ;;  %v683_v1 = vmov 0.0   ;;  %v155_v2 = vld [vmem:[#allocation2] sm:$0xff]  ;;  %v156_v3 = vld [vmem:[#allocation2 + $0x8] sm:$0xff] }
  0x2b   : > { %673 = vsyncadd (%p778_p7), [#allocation3], 4294964736  ;;  %608 = vmatprep.subr.bf16.mxu0 %v681_v0  ;;  %590 = vmatprep.mubr.msk.f32.mxu0 %vm682_vm0, %v683_v1  ;;  %v157_v4 = vld [vmem:[#allocation2 + $0x10] sm:$0xff]  ;;  %v609_v5 = vpack.c.bf16 %v156_v3, %v155_v2  ;;  %v158_v6 = vld [vmem:[#allocation2 + $0x18] sm:$0xff]  ;;  %vm164_vm1 = vcmask 261120   ;;  %vm247_vm3 = vcmask 64512  }
  0x2c   : > { %593 = vmatprep.subr.mxu1 %v683_v1  ;;  %595 = vmatprep.mubr.msk.f32.mxu1 %vm682_vm0, %v683_v1  ;;  %s780_s10 = smov (!%p146_p2, %s705_s10), 7  ;;  %v612_v7 = vpack.c.bf16 %v158_v6, %v157_v4  ;;  %v241_v9 = vld [vmem:[#allocation2 + $0x20] sm:$0xff]  ;;  %v561_v10 = vld [vmem:[#allocation2 + $0x50] ss:$0 sm:$0xff]  ;;  %vm485_vm6 = vcmask 31744  }
  0x2d   : > { %s559_s27 = sshll.u32 %s780_s10, 3  ;;  %610 = vmatpush3.bf16.msra.mxu0 %v609_v5  ;;  %594 = vmatpush3.msra.mxu1 %v241_v9  ;;  %v324_v16 = vld [vmem:[#allocation2 + $0x30] sm:$0xff]  ;;  %v563_v17 = vld [vmem:[#allocation2 + $0x60] ss:$0 sm:$0xff] }
  0x2e   : > { %611 = vmatprep.subr.bf16.mxu0 %v681_v0  ;;  %s149_s30 = scalar_lea.vmem %s769_s0, %s559_s27  ;;  %598 = vmatprep.subr.mxu1 %v683_v1  ;;  %v406_v23 = vld [vmem:[#allocation2 + $0x40] sm:$0xff]  ;;  %v565_v24 = vld [vmem:[#allocation2 + $0x70] ss:$0 sm:$0xff]  ;;  %s153_s5 = scalar_lea.vmem %s771_s2, %s559_s27 }
  0x2f   : > { %v154_v8 = vld [vmem:[%s149_s30] sm:$0xff] }
  0x30   : > { %v567_v30 = vld [vmem:[#allocation2 + $0x80] ss:$0 sm:$0xff] }
  0x31   : > { %613 = vmatpush3.bf16.msra.mxu0 %v612_v7 }
  0x34   : > { %591 = vmatmul.mubr.msk.f32.vlgmr.msra.gmra.mrb[0].mxu0 %vm164_vm1, %v154_v8 }
 0x107   : > { %v234_v11 = vpop.f32.mrb[0].mxu0 }
 0x108   : > { %v235_v12 = vadd.f32 %v561_v10, %v234_v11  ;;  %v592_v13 = vpop.f32.mrb[1].mxu0 }
 0x10a   : > { %vm238_vm2 = vcmp.gt.f32.partialorder %v235_v12, 0.0  ;;  %v239_v14 = vmul.f32 0.01, %v235_v12 }
 0x10c   : > { %v240_v15 = vsel %vm238_vm2, %v235_v12, %v239_v14 }
 0x10d   : > { %596 = vmatmul.mubr.msk.f32.vlgmr.msra.gmra.mrb[0].mxu1 %vm247_vm3, %v240_v15 }
 0x10e   : > { %600 = vmatprep.mubr.msk.f32.mxu1 %vm682_vm0, %v683_v1  ;;  %599 = vmatpush3.msra.mxu1 %v324_v16 }
 0x10f   : > { %603 = vmatprep.subr.mxu1 %v683_v1 }
 0x1e0   : > { %v317_v18 = vpop.f32.mrb[0].mxu1 }
 0x1e1   : > { %v318_v19 = vadd.f32 %v563_v17, %v317_v18  ;;  %v597_v20 = vpop.f32.mrb[1].mxu1 }
 0x1e3   : > { %vm321_vm4 = vcmp.gt.f32.partialorder %v318_v19, 0.0  ;;  %v322_v21 = vmul.f32 0.01, %v318_v19 }
 0x1e5   : > { %v323_v22 = vsel %vm321_vm4, %v318_v19, %v322_v21 }
 0x1e6   : > { %601 = vmatmul.mubr.msk.f32.vlgmr.msra.gmra.mrb[2].mxu1 %vm247_vm3, %v323_v22 }
 0x1e7   : > { %605 = vmatprep.mubr.msk.f32.mxu1 %vm682_vm0, %v683_v1  ;;  %604 = vmatpush3.msra.mxu1 %v406_v23 }
 0x2b9   : > { %v399_v25 = vpop.f32.mrb[2].mxu1 }
 0x2ba   : > { %v400_v26 = vadd.f32 %v565_v24, %v399_v25  ;;  %v602_v27 = vpop.f32.mrb[3].mxu1 }
 0x2bc   : > { %vm403_vm5 = vcmp.gt.f32.partialorder %v400_v26, 0.0  ;;  %v404_v28 = vmul.f32 0.01, %v400_v26 }
 0x2be   : > { %v405_v29 = vsel %vm403_vm5, %v400_v26, %v404_v28 }
 0x2bf   : > { %606 = vmatmul.mubr.msk.f32.vlgmr.msra.gmra.mrb[4].mxu1 %vm247_vm3, %v405_v29 }
 0x392   : > { %v481_v31 = vpop.f32.mrb[4].mxu1 }
 0x393   : > { %v482_v32 = vadd.f32 %v567_v30, %v481_v31  ;;  %v607_v33 = vpop.f32.mrb[5].mxu1 }
 0x395   : > { %486 = vst.msk [vmem:[%s153_s5] sm:$0xff] %vm485_vm6, %v482_v32 }
 0x396 PF: > { %s13_s9 = sadd.s32 1, %s676_s9  }
 0x397   : > { %p10_p3 = scmp.ge.s32.totalorder %s13_s9, 10  }
 0x399   :  { %12 = sbr.rel (!%p10_p3) target bundleno = 1 (0x1), region = 63 }
 0x3a0   :  { %506 = vsyncpa [#allocation3], 1 }
 0x3a1   :  { %508 = vsyncpa [#allocation3 + $0x1], 1 }

</bundles_post_ra>
